<compile_context>
chip_gen: v5e
topology: v5e:2x2
jax: 0.10.0
libtpu: 0.0.40
codegen_flags: <defaults>
</compile_context>

<pallas_src>
import functools

import jax
import jax.numpy as jnp
from jax.experimental import pallas as pl
from jax.experimental.pallas import tpu as pltpu


# ----------------------------- kernel ---------------------------------------


def policy_kernel(in_ref, w1_ref, w2_ref, w3_ref, bias_ref, out_ref,
                  *, action_space):
    A = action_space
    slab = in_ref[...]                       # (B, 256): [x | pad | noise | pad]
    x = slab[:, 0:128]                       # 128-aligned slice (zero-padded x)
    noise = slab[:, 128:128 + A]             # 128-offset, A lanes

    b1 = bias_ref[:, 0:128]                  # [b1 | bv1]
    b2 = bias_ref[:, 128:384]                # [b2 | bv2]
    b3 = bias_ref[:, 384:512]                # full 128 lanes: [bv3 | bmu | 0...]
    logstd_full = bias_ref[:, 512:640]       # full 128 lanes: [logstd | 0...]

    # ---- fused actor+critic trunk: 3 lane-dense MXU matmuls ----
    h1 = jnp.maximum(
        jnp.dot(x, w1_ref[...], preferred_element_type=jnp.float32) + b1, 0.0)
    h2 = jnp.maximum(
        jnp.dot(h1, w2_ref[...], preferred_element_type=jnp.float32) + b2, 0.0)
    h3 = jnp.dot(h2, w3_ref[...], preferred_element_type=jnp.float32) + b3

    # L3 column layout: lane 0 = critic value, lanes 1:1+A = mu pre-image.
    v = h3[:, 0:1]                           # critic head (B, 1)
    mean = jnp.tanh(h3[:, 1:1 + A])          # actor head  (B, A)

    # exp on the whole 128-lane vreg (EUP slot is otherwise idle), slice after.
    std_full = jnp.exp(logstd_full)          # (1, 128)
    std = std_full[:, 0:A]                   # (1, A)
    logstd = logstd_full[:, 0:A]             # (1, A)

    action = mean + std * noise              # torch.normal(mean, std)

    # ---- log_normal_density(action, mean, log_std, std) ----
    variance = std * std
    log_density = (-(action - mean) ** 2 / (2.0 * variance)
                   - 0.5 * jnp.log(2.0 * jnp.pi)
                   - logstd)
    logprob = jnp.sum(log_density, axis=1, keepdims=True)   # (B, 1)

    # ---- single lane-dense packed output: [v | logprob | action | mean | 0] ----
    B = slab.shape[0]
    pieces = [v, logprob, action, mean]
    pad_w = 128 - (2 + 2 * A)
    if pad_w > 0:                            # guard zero-width concatenate
        pieces.append(jnp.zeros((B, pad_w), jnp.float32))
    out_ref[...] = jnp.concatenate(pieces, axis=1)


# ----------------------------- packing (done once) ---------------------------


def pack_policy_params(p):
    """Pack per-layer params into lane-dense fused matmul operands."""
    A = p["wmu"].shape[1]
    S = p["w1"].shape[0]
    assert S <= 128, "state_space must fit the padded 128-lane input"
    assert 2 + 2 * A <= 128, "output packing assumes 2 + 2*A <= 128"

    # Layer 1: [w1 | wv1], zero-padded rows to K=128 -> (128, 128) dense tile.
    w1 = jnp.zeros((128, 128), jnp.float32)
    w1 = w1.at[:S, 0:64].set(p["w1"]).at[:S, 64:128].set(p["wv1"])

    # Layer 2: block-diagonal -> (128, 256).
    w2 = jnp.zeros((128, 256), jnp.float32)
    w2 = w2.at[:64, :128].set(p["w2"]).at[64:, 128:].set(p["wv2"])

    # Layer 3: padded to 128 output lanes; col 0 = critic, cols 1:1+A = mu.
    w3 = jnp.zeros((256, 128), jnp.float32)
    w3 = w3.at[128:, 0:1].set(p["wv3"]).at[:128, 1:1 + A].set(p["wmu"])

    # Biases + logstd packed into one lane-aligned (1, 640) row.
    bias = jnp.zeros((1, 640), jnp.float32)
    bias = bias.at[:, 0:64].set(p["b1"]).at[:, 64:128].set(p["bv1"])
    bias = bias.at[:, 128:256].set(p["b2"]).at[:, 256:384].set(p["bv2"])
    bias = bias.at[:, 384:385].set(p["bv3"])
    bias = bias.at[:, 385:385 + A].set(p["bmu"])
    bias = bias.at[:, 512:512 + A].set(p["logstd"])
    return dict(w1=w1, w2=w2, w3=w3, bias=bias,
                action_space=A, state_space=S)


# ----------------------------- wrapper ---------------------------------------


def policy_forward(x, noise, packed, *, batch_tile=256):
    B, S = x.shape
    A = packed["action_space"]
    assert S == packed["state_space"]
    assert noise.shape == (B, A)

    # Pad batch to a multiple of the batch tile (>= sublane multiple of 8).
    tb = min(batch_tile, max(8, -(-B // 8) * 8))
    B_pad = -(-B // tb) * tb

    # Fused lane-aligned input slab: [x | 0..128 | noise | 0..256].
    slab = jnp.zeros((B_pad, 256), jnp.float32)
    slab = slab.at[:B, :S].set(x)
    slab = slab.at[:B, 128:128 + A].set(noise)

    grid = (B_pad // tb,)
    cost = pl.CostEstimate(
        flops=2 * B_pad * (128 * 128 + 128 * 256 + 256 * 128),
        transcendentals=B_pad * A + 128,          # tanh head + full-lane exp
        bytes_accessed=(slab.size + packed["w1"].size + packed["w2"].size
                        + packed["w3"].size + packed["bias"].size
                        + B_pad * 128) * 4,
    )

    out = pl.pallas_call(
        functools.partial(policy_kernel, action_space=A),
        out_shape=jax.ShapeDtypeStruct((B_pad, 128), jnp.float32),
        grid=grid,
        in_specs=[
            pl.BlockSpec((tb, 256), lambda i: (i, 0)),    # fused x+noise slab
            pl.BlockSpec((128, 128), lambda i: (0, 0)),   # resident weights
            pl.BlockSpec((128, 256), lambda i: (0, 0)),
            pl.BlockSpec((256, 128), lambda i: (0, 0)),
            pl.BlockSpec((1, 640), lambda i: (0, 0)),     # packed bias/logstd
        ],
        out_specs=pl.BlockSpec((tb, 128), lambda i: (i, 0)),
        compiler_params=pltpu.CompilerParams(
            dimension_semantics=("parallel",)),
        cost_estimate=cost,
    )(slab, packed["w1"], packed["w2"], packed["w3"], packed["bias"])

    v = out[:B, 0:1]
    logprob = out[:B, 1:2]
    action = out[:B, 2:2 + A]
    mean = out[:B, 2 + A:2 + 2 * A]
    return v, action, logprob, mean


# ----------------------------- init (nn.Linear-like) -------------------------


def init_linear(key, fan_in, fan_out, weight_scale=None):
    """Stand-in for nn.Linear default init (U(-1/sqrt(in), 1/sqrt(in)))."""
    kw, kb = jax.random.split(key)
    bound = 1.0 / jnp.sqrt(jnp.float32(fan_in))
    w = jax.random.uniform(kw, (fan_in, fan_out), jnp.float32, -bound, bound)
    b = jax.random.uniform(kb, (1, fan_out), jnp.float32, -bound, bound)
    if weight_scale is not None:
        w = w * weight_scale
    return w, b


def init_policy_params(key, state_space, action_space):
    keys = jax.random.split(key, 6)
    w1, b1 = init_linear(keys[0], state_space, 64)
    w2, b2 = init_linear(keys[1], 64, 128)
    wmu, bmu = init_linear(keys[2], 128, action_space, weight_scale=0.1)  # mu.weight.mul_(0.1)
    wv1, bv1 = init_linear(keys[3], state_space, 64)
    wv2, bv2 = init_linear(keys[4], 64, 128)
    # NOTE: original code calls value_fc3.weight.data.mul(0.1) (non in-place) -> no-op.
    wv3, bv3 = init_linear(keys[5], 128, 1)
    logstd = jnp.zeros((1, action_space), jnp.float32)  # nn.Parameter(torch.zeros(A))
    return dict(w1=w1, b1=b1, w2=w2, b2=b2, wmu=wmu, bmu=bmu, logstd=logstd,
                wv1=wv1, bv1=bv1, wv2=wv2, bv2=bv2, wv3=wv3, bv3=bv3)


# ----------------------------- demo / check ----------------------------------


if __name__ == "__main__":
    B, STATE, ACTION = 8, 16, 4

    key = jax.random.PRNGKey(0)
    kx, knoise, kparams = jax.random.split(key, 3)

    x = jax.random.normal(kx, (B, STATE), jnp.float32)
    noise = jax.random.normal(knoise, (B, ACTION), jnp.float32)  # N(0,1) for torch.normal
    params = init_policy_params(kparams, STATE, ACTION)
    packed = pack_policy_params(params)

    v, action, logprob, mean = policy_forward(x, noise, packed)
    jax.block_until_ready((v, action, logprob, mean))

    # pure-JAX reference (un-fused, matches the PyTorch module)
    def ref(x, noise, p):
        relu = lambda t: jnp.maximum(t, 0.0)
        h = relu(x @ p["w1"] + p["b1"])
        h = relu(h @ p["w2"] + p["b2"])
        mean = jnp.tanh(h @ p["wmu"] + p["bmu"])
        std = jnp.exp(p["logstd"])
        action = mean + std * noise
        hv = relu(x @ p["wv1"] + p["bv1"])
        hv = relu(hv @ p["wv2"] + p["bv2"])
        v = hv @ p["wv3"] + p["bv3"]
        ld = -(action - mean) ** 2 / (2 * std ** 2) - 0.5 * jnp.log(2 * jnp.pi) - p["logstd"]
        return v, action, ld.sum(1, keepdims=True), mean

    rv, ra, rl, rm = ref(x, noise, params)
    assert jnp.allclose(v, rv, atol=1e-5)
    assert jnp.allclose(action, ra, atol=1e-5)
    assert jnp.allclose(logprob, rl, atol=1e-5)
    assert jnp.allclose(mean, rm, atol=1e-5)

    print("KERNEL_OK")
</pallas_src>

<mosaic_0001>
module attributes {stable_mosaic.version = 11 : i64} {
  func.func @policy_kernel(%arg0: i32, %arg1: memref<8x256xf32, #tpu.memory_space<vmem>>, %arg2: memref<128x128xf32, #tpu.memory_space<vmem>>, %arg3: memref<128x256xf32, #tpu.memory_space<vmem>>, %arg4: memref<256x128xf32, #tpu.memory_space<vmem>>, %arg5: memref<1x640xf32, #tpu.memory_space<vmem>>, %arg6: memref<8x128xf32, #tpu.memory_space<vmem>>) attributes {dimension_semantics = [#tpu.dimension_semantics<parallel>], iteration_bounds = array<i64: 1>, scalar_prefetch = 0 : i64, scratch_operands = 0 : i64, tpu.core_type = #tpu.core_type<tc>, window_params = [{transform_indices = @transform_0, window_bounds = array<i64: 8, 256>}, {pipeline_mode = #tpu.pipeline_mode<synchronous>, transform_indices = @transform_1, window_bounds = array<i64: 128, 128>}, {pipeline_mode = #tpu.pipeline_mode<synchronous>, transform_indices = @transform_2, window_bounds = array<i64: 128, 256>}, {pipeline_mode = #tpu.pipeline_mode<synchronous>, transform_indices = @transform_3, window_bounds = array<i64: 256, 128>}, {pipeline_mode = #tpu.pipeline_mode<synchronous>, transform_indices = @transform_4, window_bounds = array<i64: 1, 640>}, {transform_indices = @transform_5, window_bounds = array<i64: 8, 128>}]} {
    %c0 = arith.constant 0 : index
    %c0_0 = arith.constant 0 : index
    %0 = vector.load %arg1[%c0, %c0_0] : memref<8x256xf32, #tpu.memory_space<vmem>>, vector<8x256xf32>
    %1 = vector.extract_strided_slice %0 {offsets = [0, 0], sizes = [8, 128], strides = [1, 1]} : vector<8x256xf32> to vector<8x128xf32>
    %2 = vector.extract_strided_slice %0 {offsets = [0, 128], sizes = [8, 4], strides = [1, 1]} : vector<8x256xf32> to vector<8x4xf32>
    %c0_1 = arith.constant 0 : index
    %c0_2 = arith.constant 0 : index
    %3 = vector.load %arg5[%c0_1, %c0_2] : memref<1x640xf32, #tpu.memory_space<vmem>>, vector<1x128xf32>
    %c0_3 = arith.constant 0 : index
    %c128 = arith.constant 128 : index
    %4 = vector.load %arg5[%c0_3, %c128] : memref<1x640xf32, #tpu.memory_space<vmem>>, vector<1x256xf32>
    %c0_4 = arith.constant 0 : index
    %c384 = arith.constant 384 : index
    %5 = vector.load %arg5[%c0_4, %c384] : memref<1x640xf32, #tpu.memory_space<vmem>>, vector<1x128xf32>
    %c0_5 = arith.constant 0 : index
    %c512 = arith.constant 512 : index
    %6 = vector.load %arg5[%c0_5, %c512] : memref<1x640xf32, #tpu.memory_space<vmem>>, vector<1x128xf32>
    %c0_6 = arith.constant 0 : index
    %c0_7 = arith.constant 0 : index
    %7 = vector.load %arg2[%c0_6, %c0_7] : memref<128x128xf32, #tpu.memory_space<vmem>>, vector<128x128xf32>
    %cst = arith.constant dense<0.000000e+00> : vector<8x128xf32>
    %8 = tpu.matmul %1, %7, %cst {dimension_numbers = #tpu.dot_dimension_numbers<[1], [0], [0], [1], [0, 0, 1, 1], [], []>} : vector<8x128xf32>, vector<128x128xf32>, vector<8x128xf32> -> vector<8x128xf32>
    %9 = vector.broadcast %3 : vector<1x128xf32> to vector<8x128xf32>
    %10 = arith.addf %8, %9 : vector<8x128xf32>
    %cst_8 = arith.constant 0.000000e+00 : f32
    %11 = vector.broadcast %cst_8 : f32 to vector<8x128xf32>
    %12 = arith.maximumf %10, %11 : vector<8x128xf32>
    %c0_9 = arith.constant 0 : index
    %c0_10 = arith.constant 0 : index
    %13 = vector.load %arg3[%c0_9, %c0_10] : memref<128x256xf32, #tpu.memory_space<vmem>>, vector<128x256xf32>
    %cst_11 = arith.constant dense<0.000000e+00> : vector<8x256xf32>
    %14 = tpu.matmul %12, %13, %cst_11 {dimension_numbers = #tpu.dot_dimension_numbers<[1], [0], [0], [1], [0, 0, 1, 1], [], []>} : vector<8x128xf32>, vector<128x256xf32>, vector<8x256xf32> -> vector<8x256xf32>
    %15 = vector.broadcast %4 : vector<1x256xf32> to vector<8x256xf32>
    %16 = arith.addf %14, %15 : vector<8x256xf32>
    %cst_12 = arith.constant 0.000000e+00 : f32
    %17 = vector.broadcast %cst_12 : f32 to vector<8x256xf32>
    %18 = arith.maximumf %16, %17 : vector<8x256xf32>
    %c0_13 = arith.constant 0 : index
    %c0_14 = arith.constant 0 : index
    %19 = vector.load %arg4[%c0_13, %c0_14] : memref<256x128xf32, #tpu.memory_space<vmem>>, vector<256x128xf32>
    %cst_15 = arith.constant dense<0.000000e+00> : vector<8x128xf32>
    %20 = tpu.matmul %18, %19, %cst_15 {dimension_numbers = #tpu.dot_dimension_numbers<[1], [0], [0], [1], [0, 0, 1, 1], [], []>} : vector<8x256xf32>, vector<256x128xf32>, vector<8x128xf32> -> vector<8x128xf32>
    %21 = vector.broadcast %5 : vector<1x128xf32> to vector<8x128xf32>
    %22 = arith.addf %20, %21 : vector<8x128xf32>
    %23 = vector.extract_strided_slice %22 {offsets = [0, 0], sizes = [8, 1], strides = [1, 1]} : vector<8x128xf32> to vector<8x1xf32>
    %24 = vector.extract_strided_slice %22 {offsets = [0, 1], sizes = [8, 4], strides = [1, 1]} : vector<8x128xf32> to vector<8x4xf32>
    %25 = math.tanh %24 : vector<8x4xf32>
    %26 = math.exp %6 : vector<1x128xf32>
    %27 = vector.extract_strided_slice %26 {offsets = [0, 0], sizes = [1, 4], strides = [1, 1]} : vector<1x128xf32> to vector<1x4xf32>
    %28 = vector.extract_strided_slice %6 {offsets = [0, 0], sizes = [1, 4], strides = [1, 1]} : vector<1x128xf32> to vector<1x4xf32>
    %29 = vector.broadcast %27 : vector<1x4xf32> to vector<8x4xf32>
    %30 = arith.mulf %29, %2 : vector<8x4xf32>
    %31 = arith.addf %25, %30 : vector<8x4xf32>
    %32 = arith.mulf %27, %27 : vector<1x4xf32>
    %33 = arith.subf %31, %25 : vector<8x4xf32>
    %34 = arith.mulf %33, %33 : vector<8x4xf32>
    %cst_16 = arith.constant 0.000000e+00 : f32
    %35 = vector.broadcast %cst_16 : f32 to vector<8x4xf32>
    %36 = arith.subf %35, %34 : vector<8x4xf32>
    %cst_17 = arith.constant 2.000000e+00 : f32
    %37 = vector.broadcast %cst_17 : f32 to vector<1x4xf32>
    %38 = arith.mulf %37, %32 : vector<1x4xf32>
    %39 = vector.broadcast %38 : vector<1x4xf32> to vector<8x4xf32>
    %40 = arith.divf %36, %39 : vector<8x4xf32>
    %cst_18 = arith.constant 6.28318548 : f32
    %41 = math.log %cst_18 : f32
    %cst_19 = arith.constant 5.000000e-01 : f32
    %42 = arith.mulf %cst_19, %41 : f32
    %43 = vector.broadcast %42 : f32 to vector<8x4xf32>
    %44 = arith.subf %40, %43 : vector<8x4xf32>
    %45 = vector.broadcast %28 : vector<1x4xf32> to vector<8x4xf32>
    %46 = arith.subf %44, %45 : vector<8x4xf32>
    %cst_20 = arith.constant dense<0.000000e+00> : vector<8xf32>
    %47 = vector.multi_reduction <add>, %46, %cst_20 [1] : vector<8x4xf32> to vector<8xf32>
    %48 = vector.shape_cast %47 : vector<8xf32> to vector<8x1xf32>
    %cst_21 = arith.constant 0.000000e+00 : f32
    %49 = vector.broadcast %cst_21 : f32 to vector<8x118xf32>
    %50 = tpu.concatenate %23, %48, %31, %25, %49 in 1 : vector<8x1xf32>, vector<8x1xf32>, vector<8x4xf32>, vector<8x4xf32>, vector<8x118xf32> -> vector<8x128xf32>
    %c0_22 = arith.constant 0 : index
    %c0_23 = arith.constant 0 : index
    %51 = vector.load %arg6[%c0_22, %c0_23] : memref<8x128xf32, #tpu.memory_space<vmem>>, vector<8x128xf32>
    tpu.vector_store %arg6[%c0_22, %c0_23], %50 {strides = array<i32>} : memref<8x128xf32, #tpu.memory_space<vmem>>, vector<8x128xf32>,
    return
  }
  func.func @transform_0(%arg0: i32) -> (i32, i32) {
    %c0_i32 = arith.constant 0 : i32
    %c0_i32_0 = arith.constant 0 : i32
    return %arg0, %c0_i32 : i32, i32
  }
  func.func @transform_1(%arg0: i32) -> (i32, i32) {
    %c0_i32 = arith.constant 0 : i32
    %c0_i32_0 = arith.constant 0 : i32
    %c0_i32_1 = arith.constant 0 : i32
    return %c0_i32, %c0_i32_0 : i32, i32
  }
  func.func @transform_2(%arg0: i32) -> (i32, i32) {
    %c0_i32 = arith.constant 0 : i32
    %c0_i32_0 = arith.constant 0 : i32
    %c0_i32_1 = arith.constant 0 : i32
    return %c0_i32, %c0_i32_0 : i32, i32
  }
  func.func @transform_3(%arg0: i32) -> (i32, i32) {
    %c0_i32 = arith.constant 0 : i32
    %c0_i32_0 = arith.constant 0 : i32
    %c0_i32_1 = arith.constant 0 : i32
    return %c0_i32, %c0_i32_0 : i32, i32
  }
  func.func @transform_4(%arg0: i32) -> (i32, i32) {
    %c0_i32 = arith.constant 0 : i32
    %c0_i32_0 = arith.constant 0 : i32
    %c0_i32_1 = arith.constant 0 : i32
    return %c0_i32, %c0_i32_0 : i32, i32
  }
  func.func @transform_5(%arg0: i32) -> (i32, i32) {
    %c0_i32 = arith.constant 0 : i32
    %c0_i32_0 = arith.constant 0 : i32
    return %arg0, %c0_i32 : i32, i32
  }
}

</mosaic_0001>

<bundles_post_ra>
// kernel: tpu_custom_call.1
= control target key start
LH: loop header
LB: loop body
LE: loop exit
PB: predicated region body
PF: predicated region fallthrough
CT: control target
= control target key end

     0   :  { %10 = vsyncpa [#allocation3], 0  ;;  %s623_s0 = inlined_call_operand.hbm [shape: f32[8,256], index: 0, kind: input, shape index: {}]   ;;  %s624_s1 = inlined_call_operand.hbm [shape: f32[128,128], index: 1, kind: input, shape index: {}]   ;;  %s625_s2 = inlined_call_operand.hbm [shape: f32[128,256], index: 2, kind: input, shape index: {}]   ;;  %s626_s3 = inlined_call_operand.hbm [shape: f32[256,128], index: 3, kind: input, shape index: {}]   ;;  %s627_s4 = inlined_call_operand.hbm [shape: f32[1,640], index: 4, kind: input, shape index: {}]   ;;  %s628_s5 = inlined_call_operand.hbm [shape: f32[8,128], index: 5, kind: output, shape index: {}]  }
   0x1   :  { %11 = vsyncpa [#allocation6], 0 }
   0x2   :  { %12 = vsyncpa [#allocation9], 0  ;;  %s29_s20 = sshll.u32 %s624_s1, 4  ;;  %s30_s20 = int_to_ptr.hbm [resolvable:$true] %s29_s20 }
   0x3   :  { %13 = vsyncpa [#allocation4], 0  ;;  %s558_s21 = smov [#allocation5]   ;;  %s55_s25 = sshll.u32 %s626_s3, 4  ;;  %s56_s25 = int_to_ptr.hbm [resolvable:$true] %s55_s25 }
   0x4   :  { %s31_s22 = sshll.u32 %s558_s21, 4  ;;  %s559_s26 = smov 128   ;;  %s32_s22 = int_to_ptr.vmem [resolvable:$true] %s31_s22 }
   0x5   :  { %s560_s27 = smov 8   ;;  %s561_s28 = smov [#allocation8]  }
   0x6   :  { %37 = dma.hbm_to_vmem [thread:$0]  %s30_s20, 2048, %s32_s22, [#allocation6], %s559_s26, %s559_s26, %s560_s27  }
   0x7   :  { %s57_s29 = sshll.u32 %s561_s28, 4  ;;  %s19_s7 = sshll.u32 %s623_s0, 4  ;;  %s58_s29 = int_to_ptr.vmem [resolvable:$true] %s57_s29  ;;  %s20_s7 = int_to_ptr.hbm [resolvable:$true] %s19_s7 }
   0x8   :  { %63 = dma.hbm_to_vmem [thread:$0]  %s56_s25, 4096, %s58_s29, [#allocation9], %s559_s26, %s559_s26, %s560_s27  }
   0x9   :  { %s42_s9 = sshll.u32 %s625_s2, 4  ;;  %s562_s10 = smov [#allocation2]   ;;  %s43_s9 = int_to_ptr.hbm [resolvable:$true] %s42_s9 }
   0xa   :  { %s21_s11 = sshll.u32 %s562_s10, 4  ;;  %s563_s3 = smov [#allocation7]   ;;  %s22_s11 = int_to_ptr.vmem [resolvable:$true] %s21_s11 }
   0xb   :  { %24 = dma.hbm_to_vmem [thread:$0]  %s20_s7, 256, %s22_s11, [#allocation3]  }
   0xc   :  { %s44_s12 = sshll.u32 %s563_s3, 4  ;;  %s564_s13 = smov 256   ;;  %s45_s12 = int_to_ptr.vmem [resolvable:$true] %s44_s12 }
   0xd   :  { %s565_s14 = smov 16   ;;  %s69_s16 = sshll.u32 %s627_s4, 4  ;;  %s70_s16 = int_to_ptr.hbm [resolvable:$true] %s69_s16 }
   0xe   :  { %50 = dma.hbm_to_vmem [thread:$0]  %s43_s9, 4096, %s45_s12, [#allocation6], %s564_s13, %s564_s13, %s565_s14  }
   0xf   :  { %s566_s17 = smov [#allocation10]  }
  0x10   :  { %s71_s18 = sshll.u32 %s566_s17, 4  ;;  %s72_s18 = int_to_ptr.vmem [resolvable:$true] %s71_s18 }
  0x11   :  { %74 = dma.hbm_to_vmem [thread:$0]  %s70_s16, 80, %s72_s18, [#allocation9]  }
  0x12   :  { %550 = dma.done.wait [#allocation3], 256  }
  0x13   :  { %551 = vsyncadd [#allocation3], 4294967040 }
  0x14   :  { %552 = dma.done.wait [#allocation6], 6144  }
  0x15   :  { %553 = vsyncadd [#allocation6], 4294961152 }
  0x16   :  { %554 = dma.done.wait [#allocation9], 4176  }
  0x17   :  { %555 = vsyncadd [#allocation9], 4294963120  ;;  %v116_v0 = vld [vmem:[#allocation5 + $0x78] sm:$0xff]  ;;  %v115_v1 = vld [vmem:[#allocation5 + $0x70] sm:$0xff]  ;;  %s567_s2 = smov 1   ;;  %s568_s4 = smov 5  }
  0x18   :  { %120 = vmatpush.msra.mxu0 %v116_v0  ;;  %v114_v2 = vld [vmem:[#allocation5 + $0x68] sm:$0xff]  ;;  %v113_v3 = vld [vmem:[#allocation5 + $0x60] sm:$0xff]  ;;  %v112_v4 = vld [vmem:[#allocation5 + $0x58] sm:$0xff]  ;;  %s569_s19 = smov 127   ;;  %vm343_vm4 = vcmask 31744   ;;  %vm355_vm5 = vcmask 7168  }
  0x19   :  { %v171_v5 = vld [vmem:[#allocation7 + $0xf0] sm:$0xff]  ;;  %v172_v6 = vld [vmem:[#allocation7 + $0xf8] sm:$0xff]  ;;  %v169_v7 = vld [vmem:[#allocation7 + $0xe0] sm:$0xff]  ;;  %vm357_vm6 = vcmask 15360   ;;  %vm359_vm7 = vcmask 48128   ;;  %s570_s20 = smov [#allocation11]  }
  0x1a   :  { %121 = vmatpush.msra.mxu0 %v115_v1  ;;  %178 = vmatpush.msra.mxu1 %v171_v5  ;;  %v170_v8 = vld [vmem:[#allocation7 + $0xe8] sm:$0xff]  ;;  %v167_v9 = vld [vmem:[#allocation7 + $0xd0] sm:$0xff]  ;;  %v168_v11 = vld [vmem:[#allocation7 + $0xd8] sm:$0xff]  ;;  %s369_s21 = sshll.u32 %s570_s20, 4  ;;  %s371_s24 = sshll.u32 %s628_s5, 4  ;;  %vm361_vm8 = vcmask 80896   ;;  %s370_s21 = int_to_ptr.vmem [resolvable:$true] %s369_s21  ;;  %s372_s24 = int_to_ptr.hbm [resolvable:$true] %s371_s24 }
  0x1b   :  { %198 = vmatpush.msra.mxu2 %v172_v6  ;;  %v111_v10 = vld [vmem:[#allocation5 + $0x50] sm:$0xff]  ;;  %v165_v12 = vld [vmem:[#allocation7 + $0xc0] sm:$0xff]  ;;  %v110_v13 = vld [vmem:[#allocation5 + $0x48] sm:$0xff] }
  0x1c   :  { %122 = vmatpush.msra.mxu0 %v114_v2  ;;  %179 = vmatpush.msra.mxu1 %v169_v7  ;;  %v166_v14 = vld [vmem:[#allocation7 + $0xc8] sm:$0xff]  ;;  %v163_v15 = vld [vmem:[#allocation7 + $0xb0] sm:$0xff]  ;;  %v109_v16 = vld [vmem:[#allocation5 + $0x40] sm:$0xff] }
  0x1d   :  { %199 = vmatpush.msra.mxu2 %v170_v8  ;;  %v164_v17 = vld [vmem:[#allocation7 + $0xb8] sm:$0xff]  ;;  %v161_v18 = vld [vmem:[#allocation7 + $0xa0] sm:$0xff]  ;;  %v162_v20 = vld [vmem:[#allocation7 + $0xa8] sm:$0xff] }
  0x1e   :  { %123 = vmatpush.msra.mxu0 %v113_v3  ;;  %180 = vmatpush.msra.mxu1 %v167_v9  ;;  %v108_v19 = vld [vmem:[#allocation5 + $0x38] sm:$0xff]  ;;  %v159_v21 = vld [vmem:[#allocation7 + $0x90] sm:$0xff]  ;;  %v157_v24 = vld [vmem:[#allocation7 + $0x80] sm:$0xff] }
  0x1f   :  { %200 = vmatpush.msra.mxu2 %v168_v11  ;;  %v107_v22 = vld [vmem:[#allocation5 + $0x30] sm:$0xff]  ;;  %v160_v23 = vld [vmem:[#allocation7 + $0x98] sm:$0xff]  ;;  %v106_v25 = vld [vmem:[#allocation5 + $0x28] sm:$0xff] }
  0x20   :  { %124 = vmatpush.msra.mxu0 %v112_v4  ;;  %181 = vmatpush.msra.mxu1 %v165_v12  ;;  %v158_v26 = vld [vmem:[#allocation7 + $0x88] sm:$0xff]  ;;  %v155_v27 = vld [vmem:[#allocation7 + $0x70] sm:$0xff]  ;;  %v105_v28 = vld [vmem:[#allocation5 + $0x20] sm:$0xff] }
  0x21   :  { %201 = vmatpush.msra.mxu2 %v166_v14  ;;  %v156_v29 = vld [vmem:[#allocation7 + $0x78] sm:$0xff]  ;;  %v153_v30 = vld [vmem:[#allocation7 + $0x60] sm:$0xff]  ;;  %v154_v32 = vld [vmem:[#allocation7 + $0x68] sm:$0xff] }
  0x22   :  { %125 = vmatpush.msra.mxu0 %v111_v10  ;;  %182 = vmatpush.msra.mxu1 %v163_v15  ;;  %v104_v31 = vld [vmem:[#allocation5 + $0x18] sm:$0xff]  ;;  %v151_v33 = vld [vmem:[#allocation7 + $0x50] sm:$0xff]  ;;  %v149_v36 = vld [vmem:[#allocation7 + $0x40] sm:$0xff] }
  0x23   :  { %202 = vmatpush.msra.mxu2 %v164_v17  ;;  %v103_v34 = vld [vmem:[#allocation5 + $0x10] sm:$0xff]  ;;  %v152_v35 = vld [vmem:[#allocation7 + $0x58] sm:$0xff]  ;;  %v102_v37 = vld [vmem:[#allocation5 + $0x8] sm:$0xff] }
  0x24   :  { %126 = vmatpush.msra.mxu0 %v110_v13  ;;  %183 = vmatpush.msra.mxu1 %v161_v18  ;;  %v150_v38 = vld [vmem:[#allocation7 + $0x48] sm:$0xff]  ;;  %v147_v39 = vld [vmem:[#allocation7 + $0x30] sm:$0xff]  ;;  %v101_v40 = vld [vmem:[#allocation5] sm:$0xff] }
  0x25   :  { %203 = vmatpush.msra.mxu2 %v162_v20  ;;  %v148_v41 = vld [vmem:[#allocation7 + $0x38] sm:$0xff]  ;;  %v95_v42 = vld [vmem:[#allocation2] sm:$0xff]  ;;  %v145_v43 = vld [vmem:[#allocation7 + $0x20] sm:$0xff] }
  0x26   :  { %127 = vmatpush.msra.mxu0 %v109_v16  ;;  %184 = vmatpush.msra.mxu1 %v159_v21  ;;  %v146_v44 = vld [vmem:[#allocation7 + $0x28] sm:$0xff]  ;;  %v143_v45 = vld [vmem:[#allocation7 + $0x10] sm:$0xff]  ;;  %v144_v46 = vld [vmem:[#allocation7 + $0x18] sm:$0xff] }
  0x27   :  { %204 = vmatpush.msra.mxu2 %v160_v23  ;;  %v141_v47 = vld [vmem:[#allocation7] sm:$0xff]  ;;  %v142_v48 = vld [vmem:[#allocation7 + $0x8] sm:$0xff]  ;;  %v235_v49 = vld [vmem:[#allocation8 + $0x78] sm:$0xff] }
  0x28   :  { %128 = vmatpush.msra.mxu0 %v108_v19  ;;  %185 = vmatpush.msra.mxu1 %v157_v24  ;;  %v234_v50 = vld [vmem:[#allocation8 + $0x70] sm:$0xff]  ;;  %v251_v51 = vld [vmem:[#allocation8 + $0xf8] sm:$0xff]  ;;  %v233_v52 = vld [vmem:[#allocation8 + $0x68] sm:$0xff] }
  0x29   :  { %205 = vmatpush.msra.mxu2 %v158_v26  ;;  %255 = vmatpush.msra.mxu3 %v235_v49  ;;  %v250_v53 = vld [vmem:[#allocation8 + $0xf0] sm:$0xff]  ;;  %v249_v54 = vld [vmem:[#allocation8 + $0xe8] sm:$0xff]  ;;  %v232_v55 = vld [vmem:[#allocation8 + $0x60] sm:$0xff] }
  0x2a   :  { %129 = vmatpush.msra.mxu0 %v107_v22  ;;  %186 = vmatpush.msra.mxu1 %v155_v27  ;;  %v248_v56 = vld [vmem:[#allocation8 + $0xe0] sm:$0xff]  ;;  %v231_v57 = vld [vmem:[#allocation8 + $0x58] sm:$0xff]  ;;  %v230_v59 = vld [vmem:[#allocation8 + $0x50] sm:$0xff] }
  0x2b   :  { %206 = vmatpush.msra.mxu2 %v156_v29  ;;  %256 = vmatpush.msra.mxu3 %v234_v50  ;;  %v247_v58 = vld [vmem:[#allocation8 + $0xd8] sm:$0xff]  ;;  %v246_v60 = vld [vmem:[#allocation8 + $0xd0] sm:$0xff]  ;;  %v229_v61 = vld [vmem:[#allocation8 + $0x48] sm:$0xff] }
  0x2c   :  { %130 = vmatpush.msra.mxu0 %v106_v25  ;;  %187 = vmatpush.msra.mxu1 %v153_v30  ;;  %v245_v62 = vld [vmem:[#allocation8 + $0xc8] sm:$0xff]  ;;  %v228_v63 = vld [vmem:[#allocation8 + $0x40] sm:$0xff]  ;;  %v227_v1 = vld [vmem:[#allocation8 + $0x38] sm:$0xff] }
  0x2d   :  { %207 = vmatpush.msra.mxu2 %v154_v32  ;;  %257 = vmatpush.msra.mxu3 %v233_v52  ;;  %v244_v0 = vld [vmem:[#allocation8 + $0xc0] sm:$0xff]  ;;  %v243_v2 = vld [vmem:[#allocation8 + $0xb8] sm:$0xff]  ;;  %v226_v3 = vld [vmem:[#allocation8 + $0x30] sm:$0xff] }
  0x2e   :  { %131 = vmatpush.msra.mxu0 %v105_v28  ;;  %188 = vmatpush.msra.mxu1 %v151_v33  ;;  %v242_v4 = vld [vmem:[#allocation8 + $0xb0] sm:$0xff]  ;;  %v225_v5 = vld [vmem:[#allocation8 + $0x28] sm:$0xff]  ;;  %v224_v6 = vld [vmem:[#allocation8 + $0x20] sm:$0xff] }
  0x2f   :  { %208 = vmatpush.msra.mxu2 %v152_v35  ;;  %258 = vmatpush.msra.mxu3 %v232_v55  ;;  %v223_v7 = vld [vmem:[#allocation8 + $0x18] sm:$0xff]  ;;  %v397_v8 = vld [vmem:[#allocation10] ss:$0 sm:$0xff]  ;;  %v100_v12 = vld [vmem:[#allocation10 + $0x4] sm:$0x1] }
  0x30   :  { %132 = vmatpush.msra.mxu0 %v104_v31  ;;  %189 = vmatpush.msra.mxu1 %v149_v36  ;;  %v296_v13 = vmul.f32 1.442695, %v100_v12  ;;  %v222_v14 = vld [vmem:[#allocation8 + $0x10] sm:$0xff]  ;;  %v241_v15 = vld [vmem:[#allocation8 + $0xa8] sm:$0xff]  ;;  %v240_v17 = vld [vmem:[#allocation8 + $0xa0] sm:$0xff] }
  0x31   :  { %209 = vmatpush.msra.mxu2 %v150_v38  ;;  %259 = vmatpush.msra.mxu3 %v231_v57  ;;  %v221_v16 = vld [vmem:[#allocation8 + $0x8] sm:$0xff]  ;;  %v220_v18 = vld [vmem:[#allocation8] sm:$0xff]  ;;  %v239_v19 = vld [vmem:[#allocation8 + $0x98] sm:$0xff] }
  0x32   :  { %133 = vmatpush.msra.mxu0 %v103_v34  ;;  %190 = vmatpush.msra.mxu1 %v147_v39  ;;  %400 = vpow2.f32 %v296_v13  ;;  %v238_v21 = vld [vmem:[#allocation8 + $0x90] sm:$0xff]  ;;  %v237_v23 = vld [vmem:[#allocation8 + $0x88] sm:$0xff]  ;;  %v236_v25 = vld [vmem:[#allocation8 + $0x80] sm:$0xff] }
  0x33   :  { %210 = vmatpush.msra.mxu2 %v148_v41  ;;  %260 = vmatpush.msra.mxu3 %v230_v59  ;;  %v398_v28 = vld [vmem:[#allocation10 + $0x4] ss:$0 sm:$0xff]  ;;  %v96_v29 = vld [vmem:[#allocation2 + $0x8] sm:$0xff]  ;;  %v98_v31 = vld [vmem:[#allocation10 + $0x1] sm:$0x3] }
  0x34   :  { %134 = vmatpush.msra.mxu0 %v102_v37  ;;  %191 = vmatpush.msra.mxu1 %v145_v43  ;;  %v174_v32 = vperm.slane %v98_v31, 0  ;;  %v175_v36 = vperm.slane %v98_v31, 1 }
  0x35   :  { %211 = vmatpush.msra.mxu2 %v146_v44  ;;  %261 = vmatpush.msra.mxu3 %v229_v61 }
  0x36   :  { %135 = vmatpush.msra.mxu0 %v101_v40  ;;  %192 = vmatpush.msra.mxu1 %v143_v45 }
  0x37   :  { %136 = vmatmul.f32.vlgmr.msra.gmra.mxu0 %v95_v42  ;;  %212 = vmatpush.msra.mxu2 %v144_v46  ;;  %v399_v42 = vld [vmem:[#allocation10 + $0x3] ss:$0 sm:$0xff] }
  0x38   :  { %193 = vmatpush.msra.mxu1 %v141_v47  ;;  %275 = vmatpush.msrb.mxu0 %v251_v51  ;;  %v401_v20 = vpop.eup %400 }
  0x39   :  { %213 = vmatpush.msra.mxu2 %v142_v48  ;;  %262 = vmatpush.msra.mxu3 %v228_v63  ;;  %v307_v22 = vmul.f32 %v401_v20, %v401_v20  ;;  %v299_v27 = vperm.slane %v401_v20, 0 }
  0x3a   :  { %276 = vmatpush.msrb.mxu0 %v250_v53  ;;  %335 = vrot.lane.b32.xlu1 %v398_v28, %s567_s2 }
  0x3b   :  { %263 = vmatpush.msra.mxu3 %v227_v1  ;;  %v311_v24 = vmul.f32 2.0, %v307_v22  ;;  %v301_v30 = vmul.f32 %v299_v27, %v96_v29 }
  0x3c   :  { %277 = vmatpush.msrb.mxu0 %v249_v54 }
  0x3d   :  { %264 = vmatpush.msra.mxu3 %v226_v3  ;;  %v313_v26 = vperm.slane %v311_v24, 0 }
  0x3e   :  { %278 = vmatpush.msrb.mxu0 %v248_v56 }
  0x3f   :  { %265 = vmatpush.msra.mxu3 %v225_v5  ;;  %314 = vrot.lane.b32.xlu0 %v313_v26, %s567_s2 }
  0x40   :  { %279 = vmatpush.msrb.mxu0 %v247_v58 }
  0x41   :  { %266 = vmatpush.msra.mxu3 %v224_v6 }
  0x42   :  { %280 = vmatpush.msrb.mxu0 %v246_v60 }
  0x43   :  { %267 = vmatpush.msra.mxu3 %v223_v7 }
  0x44   :  { %281 = vmatpush.msrb.mxu0 %v245_v62 }
  0x45   :  { %268 = vmatpush.msra.mxu3 %v222_v14 }
  0x46   :  { %282 = vmatpush.msrb.mxu0 %v244_v0 }
  0x47   :  { %269 = vmatpush.msra.mxu3 %v221_v16  ;;  %303 = vrot.lane.b32.xlu0 %v301_v30, %s567_s2 }
  0x48   :  { %283 = vmatpush.msrb.mxu0 %v243_v2 }
  0x49   :  { %270 = vmatpush.msra.mxu3 %v220_v18 }
  0x4a   :  { %284 = vmatpush.msrb.mxu0 %v242_v4 }
  0x4c   :  { %285 = vmatpush.msrb.mxu0 %v241_v15 }
  0x4e   :  { %286 = vmatpush.msrb.mxu0 %v240_v17 }
  0x50   :  { %287 = vmatpush.msrb.mxu0 %v239_v19 }
  0x52   :  { %288 = vmatpush.msrb.mxu0 %v238_v21 }
  0x54   :  { %289 = vmatpush.msrb.mxu0 %v237_v23 }
  0x56   :  { %290 = vmatpush.msrb.mxu0 %v236_v25 }
  0xac   :  { %v336_v63 = vpop.permute.xlu1 %335 }
  0xb1   :  { %v315_v40 = vpop.permute.xlu0 %314 }
  0xb2   :  { %402 = vrcp.f32 %v315_v40  ;;  %vm322_vm0 = vweird.f32 %v315_v40  ;;  %v328_v52 = vand.u32 2147483648, %v315_v40  ;;  %v326_v55 = vand.u32 2147483647, %v315_v40 }
  0xb4   :  { %v137_v9 = vpop.f32.mrf.mxu0  ;;  %v329_v57 = vor.u32 1.1754944e-38, %v328_v52  ;;  %vm327_vm3 = vcmp.eq.f32.partialorder %v326_v55, 8.507059e+37 }
  0xb5   :  { %v138_v10 = vadd.f32 %v397_v8, %v137_v9 }
  0xb7   :  { %v140_v11 = vmax.f32 %v138_v10, 0.0 }
  0xb8   :  { %v403_v41 = vpop.eup %402 }
  0xb9   :  { %194 = vmatmul.f32.vlgmr.msra.gmra.mxu1 %v140_v11  ;;  %214 = vmatmul.f32.vlgmr.msra.gmra.mxu2 %v140_v11  ;;  %v318_v43 = vmul.f32 %v403_v41, %v315_v40  ;;  %v304_v50 = vpop.permute.xlu0 %303  ;;  %vm323_vm1 = vweird.f32 %v403_v41 }
  0xba   :  { %vm324_vm2 = vmor %vm322_vm0, %vm323_vm1 }
  0xbb   :  { %v319_v48 = vsub.f32 1.0, %v318_v43 }
  0xbd   :  { %v320_v49 = vmul.f32 %v403_v41, %v319_v48 }
  0xbf   :  { %v321_v54 = vadd.f32 %v403_v41, %v320_v49 }
  0xc1   :  { %v325_v59 = vsel %vm324_vm2, %v403_v41, %v321_v54 }
  0xc2   :  { %v330_v61 = vsel %vm327_vm3, %v329_v57, %v325_v59 }
 0x136   :  { %v195_v33 = vpop.f32.mrf.mxu1 }
 0x137   :  { %v196_v34 = vadd.f32 %v195_v33, %v174_v32 }
 0x139   :  { %v218_v35 = vmax.f32 %v196_v34, 0.0 }
 0x13b   :  { %271 = vmatmul.f32.vlgmr.msra.gmra.mxu3 %v218_v35 }
 0x13c   :  { %v215_v37 = vpop.f32.mrf.mxu2 }
 0x13d   :  { %v216_v38 = vadd.f32 %v215_v37, %v175_v36 }
 0x13f   :  { %v219_v39 = vmax.f32 %v216_v38, 0.0 }
 0x141   :  { %291 = vmatmul.f32.vlgmr.msrb.gmra.mxu0 %v219_v39 }
 0x1be   :  { %v272_v44 = vpop.f32.mrf.mxu3  ;;  %v292_v46 = vpop.f32.mrf.mxu0 }
 0x1bf   :  { %v273_v45 = vadd.f32 %v399_v42, %v272_v44 }
 0x1c1   :  { %v293_v47 = vadd.f32 %v292_v46, %v273_v45 }
 0x1c3   :  { %404 = vtanh.f32 %v293_v47 }
 0x1c9   :  { %v405_v51 = vpop.eup %404 }
 0x1ca   :  { %v306_v53 = vadd.f32 %v405_v51, %v304_v50  ;;  %352 = vrot.lane.b32.xlu0 %v405_v51, %s568_s4 }
 0x1cc   :  { %v308_v56 = vsub.f32 %v306_v53, %v405_v51 }
 0x1ce   :  { %v309_v58 = vmul.f32 %v308_v56, %v308_v56 }
 0x1d0   :  { %v310_v60 = vsub.f32 0.0, %v309_v58 }
 0x1d2   :  { %v331_v62 = vmul.f32 %v330_v61, %v310_v60 }
 0x1d4   :  { %v383_v0 = vadd.f32 -0.9189385, %v331_v62 }
 0x1d6   :  { %v338_v1 = vsub.f32 %v383_v0, %v336_v63 }
 0x1d8   :  { %340 = vrot.lane.b32.xlu1 %v338_v1, %s569_s19 }
 0x23c   :  { %v353_v7 = vpop.permute.xlu0 %352 }
 0x24a   :  { %v341_v2 = vpop.permute.xlu1 %340 }
 0x24b   :  { %v344_v3 = vsel %vm343_vm4, %v341_v2, 0.0 }
 0x24c   :  { %345 = vadd.xlane.f32.xlu2 %v344_v3 }
 0x264   :  { %348 = vrot.lane.b32.xlu2 %v306_v53, %s567_s2 }
 0x2bf   :  { %v346_v4 = vpop.xlane.xlu2 %345 }
 0x2c0   :  { %v356_v5 = vsel %vm355_vm5, %v293_v47, %v346_v4 }
 0x2c7   :  { %v349_v6 = vpop.permute.xlu2 %348 }
 0x2c8   :  { %v358_v8 = vsel %vm357_vm6, %v356_v5, %v349_v6 }
 0x2c9   :  { %v360_v9 = vsel %vm359_vm7, %v358_v8, %v353_v7 }
 0x2ca   :  { %v362_v10 = vsel %vm361_vm8, %v360_v9, 0.0 }
 0x2cb   :  { %363 = vst [vmem:[#allocation11] sm:$0xff] %v362_v10 }
 0x2cc   :  { %374 = dma.vmem_to_hbm [thread:$0]  %s370_s21, 128, %s372_s24, [#allocation4]  }
 0x2cd   :  { %556 = dma.done.wait [#allocation4], 128  }
 0x2ce   :  { %557 = vsyncadd [#allocation4], 4294967168 }
 0x2cf   :  { %379 = vsyncpa [#allocation3], 1 }
 0x2d0   :  { %380 = vsyncpa [#allocation6], 1 }
 0x2d1   :  { %381 = vsyncpa [#allocation9], 1 }
 0x2d2   :  { %382 = vsyncpa [#allocation4], 1 }

</bundles_post_ra>
